<compile_context>
chip_gen: v7x
topology: tpu7x:2x2x1
jax: 0.10.0
libtpu: 0.0.40
codegen_flags: <defaults>
</compile_context>

<pallas_src>
import jax
import jax.numpy as jnp
from jax import lax
from jax.experimental import pallas as pl
from jax.experimental.pallas import tpu as pltpu


def _round_up(x, m):
    return ((x + m - 1) // m) * m


# ---------------------------------------------------------------------------
# Kernel 1: fuse the frozen embedding table with the linear reducer, emitting
# the result transposed:  fused_t = w.T @ emb.T + b   -> (OUT, V)
# ---------------------------------------------------------------------------
def _fuse_table_kernel(w_t_ref, emb_ref, b_ref, out_ref, acc_ref):
    k = pl.program_id(1)

    @pl.when(k == 0)
    def _():
        acc_ref[...] = jnp.zeros_like(acc_ref)

    # (OUT, tk) x (tv, tk), contracted on tk  ->  (OUT, tv)   (trans_b style)
    acc_ref[...] += lax.dot_general(
        w_t_ref[...], emb_ref[...],
        dimension_numbers=(((1,), (1,)), ((), ())),
        preferred_element_type=jnp.float32)

    @pl.when(k == pl.num_programs(1) - 1)
    def _():
        out_ref[...] = (acc_ref[...] + b_ref[...]).astype(out_ref.dtype)


def _fuse_table(embed_table, w, b):
    """Returns fused_t of shape (OUT, Vp), Vp = V padded to the V-tile."""
    V, D = embed_table.shape
    OUT = w.shape[1]
    dtype = embed_table.dtype

    # Robust tiling: 512-tiles (or the full dim when smaller), inputs padded
    # to exact multiples so huge / non-divisible vocabs never make an
    # oversized block.  Zero padding along D contributes 0 to the dot.
    tv = 512 if V > 512 else V
    tk = 512 if D > 512 else D
    Vp = _round_up(V, tv)
    Dp = _round_up(D, tk)

    emb_p = embed_table
    if (Vp, Dp) != (V, D):
        emb_p = jnp.pad(embed_table, ((0, Vp - V), (0, Dp - D)))
    w_t = w.T.astype(dtype)                       # (OUT, D): tiny transpose
    if Dp != D:
        w_t = jnp.pad(w_t, ((0, 0), (0, Dp - D)))
    b2d = b.reshape(OUT, 1).astype(dtype)

    return pl.pallas_call(
        _fuse_table_kernel,
        out_shape=jax.ShapeDtypeStruct((OUT, Vp), dtype),
        grid_spec=pltpu.PrefetchScalarGridSpec(
            num_scalar_prefetch=0,
            grid=(Vp // tv, Dp // tk),
            in_specs=[
                pl.BlockSpec((OUT, tk), lambda i, k: (0, k)),   # w.T
                pl.BlockSpec((tv, tk), lambda i, k: (i, k)),    # emb
                pl.BlockSpec((OUT, 1), lambda i, k: (0, 0)),    # bias
            ],
            out_specs=pl.BlockSpec((OUT, tv), lambda i, k: (0, i)),
            scratch_shapes=[pltpu.VMEM((OUT, tv), jnp.float32)],
        ),
        compiler_params=pltpu.CompilerParams(
            dimension_semantics=("parallel", "arbitrary"),
            vmem_limit_bytes=32 * 1024 * 1024),
    )(w_t, emb_p, b2d)


# ---------------------------------------------------------------------------
# Kernel 2: batched gather from the fused (OUT, Vp) table.
#   idx_ref:     (tile_sub, 128) int32  -- tile_sub*128 token ids
#   tbl_hbm_ref: (OUT, Vp) in HBM (pl.ANY) -- copied ONCE into VMEM scratch
#   out_t_ref:   (OUT, tile_sub*128)    -- transposed, lane-dense output slab
# Gather = one-hot MXU matmuls in 256-token chunks: (OUT, Vp) @ (Vp, 256).
# ---------------------------------------------------------------------------
_CHUNK_SUB = 2   # 2 sublane rows of ids -> 256 tokens per MXU matmul


def _gather_kernel(idx_ref, tbl_hbm_ref, out_t_ref, tbl_vmem, iota_ref, sem):
    # One-time init (grid is sequential: "arbitrary"): single-buffered table
    # copy HBM -> VMEM, and the cached (Vp, 128) iota for one-hot building.
    @pl.when(pl.program_id(0) == 0)
    def _():
        cp = pltpu.make_async_copy(tbl_hbm_ref, tbl_vmem, sem)
        cp.start()
        cp.wait()
        iota_ref[...] = lax.broadcasted_iota(jnp.int32, iota_ref.shape, 0)

    tbl_t = tbl_vmem[...]            # (OUT, Vp); small at these sizes
    iota_v = iota_ref[...]           # (Vp, 128)
    tile_sub = idx_ref.shape[0]

    for c in range(tile_sub // _CHUNK_SUB):                   # static unroll
        # Build a (Vp, 256) one-hot by concatenating two lane-tile-aligned
        # (Vp, 128) one-hots.  Out-of-range ids give an all-zero column.
        parts = [
            (iota_v == idx_ref[c * _CHUNK_SUB + s:c * _CHUNK_SUB + s + 1, :]
             ).astype(tbl_t.dtype)
            for s in range(_CHUNK_SUB)
        ]
        onehot_t = jnp.concatenate(parts, axis=1)             # (Vp, 256)
        lo = c * _CHUNK_SUB * 128
        out_t_ref[:, lo:lo + _CHUNK_SUB * 128] = jnp.dot(
            tbl_t, onehot_t, preferred_element_type=jnp.float32
        ).astype(out_t_ref.dtype)


def object_embed(idx, embed_table, w, b):
    """ObjectEmbed.forward.

    idx:         int32 (B, S) token / object ids
    embed_table: float32 (V, D) "pretrained" embedding weights
    w:           float32 (D, OUT) reducer weight (PyTorch weight.T)
    b:           float32 (OUT,)   reducer bias
    returns:     float32 (B, S, OUT)
    """
    B, S = idx.shape
    V, D = embed_table.shape
    OUT = w.shape[1]
    N = B * S

    # --- fuse Embedding + Linear once, already transposed -------------------
    fused_t = _fuse_table(embed_table, w, b)        # (OUT, Vp)
    Vp = fused_t.shape[1]

    # --- token tiling: up to 32 sublane rows x 128 lanes = 4096 tokens/step -
    tile_sub = min(32, max(8, _round_up(-(-N // 128), 8)))
    assert tile_sub % 8 == 0 and tile_sub % _CHUNK_SUB == 0
    tile_n = tile_sub * 128
    num_tiles = -(-N // tile_n)
    n_pad = num_tiles * tile_n

    idx_flat = idx.reshape(N).astype(jnp.int32)
    idx_pad = jnp.pad(idx_flat, (0, n_pad - N))     # pad with id 0, sliced off
    idx_2d = idx_pad.reshape(num_tiles * tile_sub, 128)

    # Explicit VMEM budget (v5e scoped default is only 16 MiB); capped at the
    # v7x physical 64 MiB.
    vmem_need = (OUT * Vp * 4 + Vp * 128 * 4
                 + 2 * OUT * tile_n * 4 + 2 * tile_sub * 128 * 4)
    vmem_limit = int(min(max(2 * vmem_need, 32 * 1024 * 1024),
                         64 * 1024 * 1024))

    out_t = pl.pallas_call(
        _gather_kernel,
        out_shape=jax.ShapeDtypeStruct((OUT, n_pad), embed_table.dtype),
        grid_spec=pltpu.PrefetchScalarGridSpec(
            num_scalar_prefetch=0,
            grid=(num_tiles,),
            in_specs=[
                pl.BlockSpec((tile_sub, 128), lambda i: (i, 0)),
                pl.BlockSpec(memory_space=pl.ANY),      # table stays in HBM
            ],
            out_specs=pl.BlockSpec((OUT, tile_n), lambda i: (0, i)),
            scratch_shapes=[
                pltpu.VMEM((OUT, Vp), embed_table.dtype),  # single-buf table
                pltpu.VMEM((Vp, 128), jnp.int32),          # cached iota
                pltpu.SemaphoreType.DMA,
            ],
        ),
        compiler_params=pltpu.CompilerParams(
            dimension_semantics=("arbitrary",),
            vmem_limit_bytes=vmem_limit),
    )(idx_2d, fused_t)

    # Layout plumbing only: slice BEFORE transposing (only N columns move),
    # then reshape to (B, S, OUT).
    return out_t[:, :N].T.reshape(B, S, OUT)


if __name__ == "__main__":
    key = jax.random.PRNGKey(0)
    k_emb, k_w, k_b, k_idx = jax.random.split(key, 4)

    # Synthetic deterministic parameters (no checkpoint load).
    V, D, OUT = 64, 128, 32        # num_embeddings, embedding_dim, out_dim
    B, S = 2, 8                    # batch of index sequences

    embed_table = jax.random.normal(k_emb, (V, D), dtype=jnp.float32)
    bound = 1.0 / (D ** 0.5)       # nn.Linear default init range
    w = jax.random.uniform(k_w, (D, OUT), jnp.float32, -bound, bound)
    b = jax.random.uniform(k_b, (OUT,), jnp.float32, -bound, bound)

    idx = jax.random.randint(k_idx, (B, S), 0, V, dtype=jnp.int32)

    out = jax.block_until_ready(object_embed(idx, embed_table, w, b))

    # Pure-JAX reference: embedding lookup then linear.
    ref = embed_table[idx] @ w + b
    assert out.shape == (B, S, OUT)
    err = float(jnp.max(jnp.abs(out - ref)))
    assert jnp.allclose(out, ref, atol=1e-4, rtol=1e-4), err

    print("KERNEL_OK")
</pallas_src>

<mosaic_0001>
module attributes {stable_mosaic.version = 11 : i64} {
  func.func @_fuse_table_kernel(%arg0: i32, %arg1: i32, %arg2: memref<32x128xf32, #tpu.memory_space<vmem>>, %arg3: memref<64x128xf32, #tpu.memory_space<vmem>>, %arg4: memref<32x1xf32, #tpu.memory_space<vmem>>, %arg5: memref<32x64xf32, #tpu.memory_space<vmem>>, %arg6: memref<32x64xf32, #tpu.memory_space<vmem>>) attributes {dimension_semantics = [#tpu.dimension_semantics<parallel>, #tpu.dimension_semantics<arbitrary>], iteration_bounds = array<i64: 1, 1>, scalar_prefetch = 0 : i64, scratch_operands = 1 : i64, tpu.core_type = #tpu.core_type<tc>, window_params = [{transform_indices = @transform_0, window_bounds = array<i64: 32, 128>}, {transform_indices = @transform_1, window_bounds = array<i64: 64, 128>}, {pipeline_mode = #tpu.pipeline_mode<synchronous>, transform_indices = @transform_2, window_bounds = array<i64: 32, 1>}, {transform_indices = @transform_3, window_bounds = array<i64: 32, 64>}]} {
    %c0_i32 = arith.constant 0 : i32
    %0 = arith.cmpi eq, %arg1, %c0_i32 : i32
    %1 = arith.extui %0 : i1 to i32
    %c0_i32_0 = arith.constant 0 : i32
    %2 = arith.cmpi ne, %1, %c0_i32_0 : i32
    scf.if %2 {
      %cst_10 = arith.constant 0.000000e+00 : f32
      %12 = vector.broadcast %cst_10 : f32 to vector<32x64xf32>
      %c0_11 = arith.constant 0 : index
      %c0_12 = arith.constant 0 : index
      %13 = vector.load %arg6[%c0_11, %c0_12] : memref<32x64xf32, #tpu.memory_space<vmem>>, vector<32x64xf32>
      tpu.vector_store %arg6[%c0_11, %c0_12], %12 {strides = array<i32>} : memref<32x64xf32, #tpu.memory_space<vmem>>, vector<32x64xf32>,
    } else {
    }
    %c0 = arith.constant 0 : index
    %c0_1 = arith.constant 0 : index
    %3 = vector.load %arg6[%c0, %c0_1] : memref<32x64xf32, #tpu.memory_space<vmem>>, vector<32x64xf32>
    %c0_2 = arith.constant 0 : index
    %c0_3 = arith.constant 0 : index
    %4 = vector.load %arg2[%c0_2, %c0_3] : memref<32x128xf32, #tpu.memory_space<vmem>>, vector<32x128xf32>
    %c0_4 = arith.constant 0 : index
    %c0_5 = arith.constant 0 : index
    %5 = vector.load %arg3[%c0_4, %c0_5] : memref<64x128xf32, #tpu.memory_space<vmem>>, vector<64x128xf32>
    %cst = arith.constant dense<0.000000e+00> : vector<32x64xf32>
    %6 = tpu.matmul %4, %5, %cst {dimension_numbers = #tpu.dot_dimension_numbers<[1], [1], [0], [0], [0, 0, 1, 0], [], []>} : vector<32x128xf32>, vector<64x128xf32>, vector<32x64xf32> -> vector<32x64xf32>
    %7 = arith.addf %3, %6 : vector<32x64xf32>
    %c0_6 = arith.constant 0 : index
    %c0_7 = arith.constant 0 : index
    %8 = vector.load %arg6[%c0_6, %c0_7] : memref<32x64xf32, #tpu.memory_space<vmem>>, vector<32x64xf32>
    tpu.vector_store %arg6[%c0_6, %c0_7], %7 {strides = array<i32>} : memref<32x64xf32, #tpu.memory_space<vmem>>, vector<32x64xf32>,
    %c0_i32_8 = arith.constant 0 : i32
    %9 = arith.cmpi eq, %arg1, %c0_i32_8 : i32
    %10 = arith.extui %9 : i1 to i32
    %c0_i32_9 = arith.constant 0 : i32
    %11 = arith.cmpi ne, %10, %c0_i32_9 : i32
    scf.if %11 {
      %c0_10 = arith.constant 0 : index
      %c0_11 = arith.constant 0 : index
      %12 = vector.load %arg6[%c0_10, %c0_11] : memref<32x64xf32, #tpu.memory_space<vmem>>, vector<32x64xf32>
      %c0_12 = arith.constant 0 : index
      %c0_13 = arith.constant 0 : index
      %13 = vector.load %arg4[%c0_12, %c0_13] : memref<32x1xf32, #tpu.memory_space<vmem>>, vector<32x1xf32>
      %14 = vector.broadcast %13 : vector<32x1xf32> to vector<32x64xf32>
      %15 = arith.addf %12, %14 : vector<32x64xf32>
      %c0_14 = arith.constant 0 : index
      %c0_15 = arith.constant 0 : index
      %16 = vector.load %arg5[%c0_14, %c0_15] : memref<32x64xf32, #tpu.memory_space<vmem>>, vector<32x64xf32>
      tpu.vector_store %arg5[%c0_14, %c0_15], %15 {strides = array<i32>} : memref<32x64xf32, #tpu.memory_space<vmem>>, vector<32x64xf32>,
    } else {
    }
    return
  }
  func.func @transform_0(%arg0: i32, %arg1: i32) -> (i32, i32) {
    %c0_i32 = arith.constant 0 : i32
    %c0_i32_0 = arith.constant 0 : i32
    return %c0_i32, %arg1 : i32, i32
  }
  func.func @transform_1(%arg0: i32, %arg1: i32) -> (i32, i32) {
    %c0_i32 = arith.constant 0 : i32
    return %arg0, %arg1 : i32, i32
  }
  func.func @transform_2(%arg0: i32, %arg1: i32) -> (i32, i32) {
    %c0_i32 = arith.constant 0 : i32
    %c0_i32_0 = arith.constant 0 : i32
    %c0_i32_1 = arith.constant 0 : i32
    return %c0_i32, %c0_i32_0 : i32, i32
  }
  func.func @transform_3(%arg0: i32, %arg1: i32) -> (i32, i32) {
    %c0_i32 = arith.constant 0 : i32
    %c0_i32_0 = arith.constant 0 : i32
    return %c0_i32, %arg0 : i32, i32
  }
}

</mosaic_0001>

<bundles_post_ra>
// kernel: tpu_custom_call.1
= control target key start
LH: loop header
LB: loop body
LE: loop exit
PB: predicated region body
PF: predicated region fallthrough
CT: control target
= control target key end

     0   :  { %8 = vsyncpa [#allocation4], 0  ;;  %s410_s0 = inlined_call_operand.vmem [shape: f32[32,128], index: 0, kind: input, shape index: {}]   ;;  %s411_s1 = inlined_call_operand.hbm [shape: f32[64,128], index: 1, kind: input, shape index: {}]   ;;  %s412_s2 = inlined_call_operand.vmem [shape: f32[32,1], index: 2, kind: input, shape index: {}]   ;;  %s413_s3 = inlined_call_operand.hbm [shape: f32[32,64], index: 3, kind: output, shape index: {}]  }
   0x1   :  { %9 = vsyncpa [#allocation5], 0  ;;  %s318_s12 = smov [#allocation3]   ;;  %s270_s16 = scalar_lea.hbm %s411_s1, 1024 }
   0x2   :  { %s17_s13 = sshll.u32 %s318_s12, 4  ;;  %p271_p0 = scmp.ne.s32.totalorder %s411_s1, %s270_s16  ;;  %s18_s13 = int_to_ptr.vmem [resolvable:$true] %s17_s13 }
   0x3   :  { %p274_p1 = scmp.lt.u32.totalorder %s270_s16, %s411_s1 }
   0x5   :  { %p276_p2 = pnand %p274_p1, %p271_p0 }
   0x7   :  { %279 = shalt.err (!%p276_p2)
}
   0x8   :  { %s280_s21 = scalar_lea.vmem %s18_s13, 1024  ;;  %p285_p4 = scmp.lt.s32.totalorder %s18_s13, %s18_s13 }
   0x9   :  { %p281_p3 = scmp.ne.s32.totalorder %s18_s13, %s280_s21  ;;  %p286_p5 = scmp.lt.s32.totalorder %s280_s21, %s280_s21 }
   0xb   :  { %p287_p6 = por %p286_p5, %p285_p4 }
   0xd   :  { %p288_p7 = pnand %p287_p6, %p281_p3 }
   0xf   :  { %291 = shalt.err (!%p288_p7)
}
  0x10   :  { %s319_s22 = smov 128   ;;  %s320_s23 = smov 8  }
  0x11   :  { %23 = dma.hbm_to_vmem [thread:$0]  %s411_s1, 1024, %s18_s13, [#allocation4], %s319_s22, %s319_s22, %s320_s23  }
  0x12   :  { %314 = dma.done.wait [#allocation4], 1024  }
  0x13   :  { %315 = vsyncadd [#allocation4], 4294966272  ;;  %vm33_vm0 = vcmask 523264   ;;  %v321_v0 = vmov 0   ;;  %v322_v1 = vmov 0.0   ;;  %v46_v2 = vld [vmem:[#allocation3] sm:$0xff] }
  0x14   :  { %269 = vset.pattern.permute.xlu1 %v321_v0  ;;  %268 = vset.pattern.permute.xlu0 %v321_v0  ;;  %35 = vst.msk [vmem:[#allocation2 + $0x8] sm:$0xff] %vm33_vm0, %v322_v1  ;;  %34 = vst.msk [vmem:[#allocation2] sm:$0xff] %vm33_vm0, %v322_v1  ;;  %v47_v3 = vld [vmem:[#allocation3 + $0x8] sm:$0xff]  ;;  %v48_v4 = vld [vmem:[#allocation3 + $0x10] sm:$0xff] }
  0x15   :  { %36 = vst.msk [vmem:[#allocation2 + $0x10] sm:$0xff] %vm33_vm0, %v322_v1  ;;  %37 = vst.msk [vmem:[#allocation2 + $0x18] sm:$0xff] %vm33_vm0, %v322_v1  ;;  %v238_v5 = vpack.c.bf16 %v47_v3, %v46_v2  ;;  %v49_v6 = vld [vmem:[#allocation3 + $0x18] sm:$0xff]  ;;  %v42_v8 = vld [vmem:[%s410_s0] sm:$0xff] }
  0x16   :  { %v242_v7 = vpack.c.bf16 %v49_v6, %v48_v4  ;;  %v44_v9 = vld [vmem:[%s410_s0 + $0x10] sm:$0xff]  ;;  %v155_v11 = vld [vmem:[%s412_s2] sm:$0xff]  ;;  %v51_v13 = vld [vmem:[#allocation3 + $0x28] sm:$0xff]  ;;  %232 = vmatprep.mubr.f32.mxu0 %v42_v8 }
  0x17   :  { %239 = vmatprep.subr.bf16.mxu0 %v238_v5  ;;  %254 = vmatprep.subr.bf16.mxu1 %v238_v5  ;;  %v157_v10 = vld [vmem:[%s412_s2 + $0x10] sm:$0xff]  ;;  %v50_v12 = vld [vmem:[#allocation3 + $0x20] sm:$0xff]  ;;  %v158_v14 = vld [vmem:[%s412_s2 + $0x18] sm:$0xff] }
  0x18   :  { %241 = vmatpush3.bf16.xpose.msra.mxu0 %v238_v5  ;;  %258 = vmatpush3.bf16.xpose.msra.mxu1 %v238_v5  ;;  %v156_v15 = vld [vmem:[%s412_s2 + $0x8] sm:$0xff]  ;;  %v246_v16 = vpack.c.bf16 %v51_v13, %v50_v12  ;;  %v52_v17 = vld [vmem:[#allocation3 + $0x30] sm:$0xff]  ;;  %v53_v18 = vld [vmem:[#allocation3 + $0x38] sm:$0xff] }
  0x19   :  { %243 = vmatprep.subr.bf16.mxu0 %v242_v7  ;;  %255 = vmatprep.subr.bf16.mxu1 %v242_v7  ;;  %v250_v19 = vpack.c.bf16 %v53_v18, %v52_v17  ;;  %v43_v20 = vld [vmem:[%s410_s0 + $0x8] sm:$0xff]  ;;  %v45_v21 = vld [vmem:[%s410_s0 + $0x18] sm:$0xff]  ;;  %s323_s0 = smov [#allocation6]  }
  0x1a   :  { %235 = vmatprep.mubr.f32.mxu1 %v44_v9  ;;  %171 = vperm.xlu1 %269, %v157_v10   ;;  %s192_s13 = sshll.u32 %s323_s0, 4  ;;  %s193_s13 = int_to_ptr.vmem [resolvable:$true] %s192_s13 }
  0x1b   :  { %161 = vperm.xlu0 %268, %v155_v11   ;;  %v39_v22 = vld [vmem:[#allocation2 + $0x8] sm:$0xff]  ;;  %v38_v24 = vld [vmem:[#allocation2] sm:$0xff]  ;;  %s292_s14 = scalar_lea.vmem %s193_s13, 512  ;;  %p297_p9 = scmp.lt.s32.totalorder %s193_s13, %s193_s13 }
  0x1c   :  { %v41_v23 = vld [vmem:[#allocation2 + $0x18] sm:$0xff]  ;;  %v40_v25 = vld [vmem:[#allocation2 + $0x10] sm:$0xff]  ;;  %p293_p8 = scmp.ne.s32.totalorder %s193_s13, %s292_s14  ;;  %p298_p10 = scmp.lt.s32.totalorder %s292_s14, %s292_s14 }
  0x1e   :  { %176 = vperm.xlu1 %269, %v158_v14   ;;  %p299_p11 = por %p298_p10, %p297_p9 }
  0x1f   :  { %166 = vperm.xlu0 %268, %v156_v15  }
  0x20   :  { %245 = vmatpush3.bf16.xpose.msra.mxu0 %v242_v7  ;;  %259 = vmatpush3.bf16.xpose.msra.mxu1 %v242_v7  ;;  %p300_p12 = pnand %p299_p11, %p293_p8 }
  0x21   :  { %247 = vmatprep.subr.bf16.mxu0 %v246_v16  ;;  %256 = vmatprep.subr.bf16.mxu1 %v246_v16 }
  0x28   :  { %249 = vmatpush3.bf16.xpose.msra.mxu0 %v246_v16  ;;  %260 = vmatpush3.bf16.xpose.msra.mxu1 %v246_v16 }
  0x29   :  { %251 = vmatprep.subr.bf16.mxu0 %v250_v19  ;;  %257 = vmatprep.subr.bf16.mxu1 %v250_v19 }
  0x30   :  { %253 = vmatpush3.bf16.xpose.msra.mxu0 %v250_v19  ;;  %261 = vmatpush3.bf16.xpose.msra.mxu1 %v250_v19 }
  0x37   :  { %233 = vmatmul.mubr.f32.vlgmr.msra.gmra.mrb[0].mxu0 %v43_v20  ;;  %236 = vmatmul.mubr.f32.vlgmr.msra.gmra.mrb[0].mxu1 %v45_v21 }
  0x99   :  { %v172_v34 = vpop.permute.xlu1 %171 }
  0x9a   :  { %v162_v35 = vpop.permute.xlu0 %161 }
  0x9d   :  { %v177_v36 = vpop.permute.xlu1 %176 }
  0x9e   :  { %v167_v38 = vpop.permute.xlu0 %166 }
 0x10a   :  { %v234_v26 = vpop.f32.mrb[0].mxu0  ;;  %v237_v27 = vpop.f32.mrb[0].mxu1 }
 0x10b   :  { %v140_v28 = vadd.f32 %v234_v26, %v39_v22  ;;  %v142_v29 = vadd.f32 %v237_v27, %v41_v23  ;;  %v120_v30 = vpop.f32.mrb[1].mxu0  ;;  %v130_v31 = vpop.f32.mrb[1].mxu1 }
 0x10c   :  { %v139_v32 = vadd.f32 %v120_v30, %v38_v24  ;;  %v141_v33 = vadd.f32 %v130_v31, %v40_v25 }
 0x10d   :  { %145 = vst.msk [vmem:[#allocation2 + $0x8] sm:$0xff] %vm33_vm0, %v140_v28  ;;  %147 = vst.msk [vmem:[#allocation2 + $0x18] sm:$0xff] %vm33_vm0, %v142_v29 }
 0x10e   :  { %144 = vst.msk [vmem:[#allocation2] sm:$0xff] %vm33_vm0, %v139_v32  ;;  %146 = vst.msk [vmem:[#allocation2 + $0x10] sm:$0xff] %vm33_vm0, %v141_v33 }
 0x114   :  { %v154_v37 = vld [vmem:[#allocation2 + $0x18] sm:$0xff]  ;;  %v152_v39 = vld [vmem:[#allocation2 + $0x8] sm:$0xff] }
 0x115   :  { %v153_v40 = vld [vmem:[#allocation2 + $0x10] sm:$0xff]  ;;  %v151_v41 = vld [vmem:[#allocation2] sm:$0xff]  ;;  %v182_v42 = vadd.f32 %v177_v36, %v154_v37  ;;  %v180_v43 = vadd.f32 %v167_v38, %v152_v39 }
 0x116   :  { %v181_v44 = vadd.f32 %v172_v34, %v153_v40  ;;  %v179_v45 = vadd.f32 %v162_v35, %v151_v41 }
 0x117   :  { %186 = vst.msk [vmem:[#allocation6 + $0x18] sm:$0xff] %vm33_vm0, %v182_v42  ;;  %184 = vst.msk [vmem:[#allocation6 + $0x8] sm:$0xff] %vm33_vm0, %v180_v43 }
 0x118   :  { %185 = vst.msk [vmem:[#allocation6 + $0x10] sm:$0xff] %vm33_vm0, %v181_v44  ;;  %183 = vst.msk [vmem:[#allocation6] sm:$0xff] %vm33_vm0, %v179_v45 }
 0x119   :  { %303 = shalt.err (!%p300_p12)
}
 0x11a   :  { %s304_s17 = scalar_lea.hbm %s413_s3, 512 }
 0x11b   :  { %p305_p13 = scmp.ne.s32.totalorder %s413_s3, %s304_s17  ;;  %p308_p0 = scmp.lt.u32.totalorder %s304_s17, %s413_s3 }
 0x11d   :  { %p310_p1 = pnand %p308_p0, %p305_p13 }
 0x11f   :  { %313 = shalt.err (!%p310_p1)
}
 0x120   :  { %198 = dma.vmem_to_hbm [thread:$0]  %s193_s13, 512, %s413_s3, [#allocation5], %s319_s22, %s319_s22, %s320_s23  }
 0x121   :  { %316 = dma.done.wait [#allocation5], 512  }
 0x122   :  { %317 = vsyncadd [#allocation5], 4294966784 }
 0x123   :  { %202 = vsyncpa [#allocation4], 1 }
 0x124   :  { %203 = vsyncpa [#allocation5], 1 }

</bundles_post_ra>
